<compile_context>
chip_gen: v7x
topology: tpu7x:2x2x1
jax: 0.10.0
libtpu: 0.0.40
codegen_flags: <defaults>
</compile_context>

<pallas_src>
import math

import jax
import jax.numpy as jnp
from jax.experimental import pallas as pl
from jax.experimental.pallas import tpu as pltpu

_HIDDEN = 128
_PAD_N = 128  # lane-dense output width (last layer zero-padded to this at init)


def _round_up(x, m):
    return (x + m - 1) // m * m


def _mlp_kernel(x_ref,
                w1_ref, b1_ref,
                w2_ref, b2_ref,
                w3_ref, b3_ref,
                w4_ref, b4_ref,
                w5_ref, b5_ref,
                o_ref):
    """Fused 5-layer MLP with ReLU between layers.

    One grid step processes an M-tile of the batch; all weights (bf16) stay
    VMEM-resident across steps. Dots take bf16 operands, accumulate in f32,
    and the final store is bf16 (lane-dense 128-wide slab).
    """
    x = x_ref[...].astype(jnp.bfloat16)  # in-kernel cast: input streamed as f32 once

    h = jnp.dot(x, w1_ref[...], preferred_element_type=jnp.float32) + b1_ref[...]
    h = jnp.maximum(h, 0.0)

    h = jnp.dot(h.astype(jnp.bfloat16), w2_ref[...],
                preferred_element_type=jnp.float32) + b2_ref[...]
    h = jnp.maximum(h, 0.0)

    h = jnp.dot(h.astype(jnp.bfloat16), w3_ref[...],
                preferred_element_type=jnp.float32) + b3_ref[...]
    h = jnp.maximum(h, 0.0)

    h = jnp.dot(h.astype(jnp.bfloat16), w4_ref[...],
                preferred_element_type=jnp.float32) + b4_ref[...]
    h = jnp.maximum(h, 0.0)

    out = jnp.dot(h.astype(jnp.bfloat16), w5_ref[...],
                  preferred_element_type=jnp.float32) + b5_ref[...]
    o_ref[...] = out.astype(o_ref.dtype)  # bf16 writeback (halves output HBM bytes)


def _choose_tile(batch, block_m):
    """Pick (tile_m, grid_m) with minimal padding waste.

    - batch <= 16: single full-extent tile (block dim == array dim is legal).
    - otherwise: at least 2 tiles so v7x megacore can shard across both TCs
      (harmless on 1-TC v5e/v6e), tiles capped at ~block_m rows, rounded to 16
      (bf16 sublane packing). The last tile may be partial; Pallas masks it.
    """
    if batch <= 16:
        return batch, 1
    grid_m = 2 if batch <= 2 * block_m else pl.cdiv(batch, block_m)
    tile_m = _round_up(pl.cdiv(batch, grid_m), 16)
    return tile_m, pl.cdiv(batch, tile_m)


def net_forward(obs, params, n_actions, state=None, *, block_m=2048):
    """Pallas equivalent of Net.forward. Returns (logits, state)."""
    batch = obs.shape[0]
    # obs.view(batch, -1); keep f32 — the bf16 cast happens inside the kernel.
    x = obs.reshape(batch, -1).astype(jnp.float32)
    state_dim = x.shape[1]

    (w1, b1), (w2, b2), (w3, b3), (w4, b4), (w5p, b5p) = params

    tile_m, grid_m = _choose_tile(batch, block_m)

    # Weights/biases: full-array blocks, constant index_map -> VMEM-resident
    # across all batch tiles.
    const_spec = lambda a: pl.BlockSpec(a.shape, lambda i: tuple(0 for _ in a.shape))

    logits_full = pl.pallas_call(
        _mlp_kernel,
        out_shape=jax.ShapeDtypeStruct((batch, _PAD_N), jnp.bfloat16),
        grid=(grid_m,),
        in_specs=[
            pl.BlockSpec((tile_m, state_dim), lambda i: (i, 0)),
            const_spec(w1), const_spec(b1),
            const_spec(w2), const_spec(b2),
            const_spec(w3), const_spec(b3),
            const_spec(w4), const_spec(b4),
            const_spec(w5p), const_spec(b5p),
        ],
        out_specs=pl.BlockSpec((tile_m, _PAD_N), lambda i: (i, 0)),
        compiler_params=pltpu.CompilerParams(
            # Batch tiles are independent -> megacore-shard on v7x.
            dimension_semantics=("parallel",),
        ),
    )(x, w1, b1, w2, b2, w3, b3, w4, b4, w5p, b5p)

    # TODO(synk): for repeated calls with fixed params, keep the ~132 KB of bf16
    # weights resident across calls (cross-call prefetch / semaphore-future
    # pattern) instead of re-streaming them every invocation — dominant lever
    # in the single-step DQN inference regime.

    logits = logits_full[:batch, :n_actions].astype(jnp.float32)
    return logits, state


def init_params(key, state_dim, action_dim, hidden=_HIDDEN):
    """Deterministic init mimicking PyTorch nn.Linear defaults
    (uniform(-1/sqrt(fan_in), 1/sqrt(fan_in))).

    Weights stored as (in, out) bfloat16; biases as (1, out) float32.
    The last layer is pre-padded to a lane-dense 128-wide slab (no per-call pad)."""
    dims = [state_dim, hidden, hidden, hidden, hidden, action_dim]
    params = []
    for i in range(5):
        fan_in, fan_out = dims[i], dims[i + 1]
        key, kw, kb = jax.random.split(key, 3)
        bound = 1.0 / math.sqrt(fan_in)
        w = jax.random.uniform(kw, (fan_in, fan_out), jnp.float32, -bound, bound)
        b = jax.random.uniform(kb, (1, fan_out), jnp.float32, -bound, bound)
        if i == 4 and fan_out < _PAD_N:  # pre-pad the output layer once, at init
            w = jnp.pad(w, ((0, 0), (0, _PAD_N - fan_out)))
            b = jnp.pad(b, ((0, 0), (0, _PAD_N - fan_out)))
        params.append((w.astype(jnp.bfloat16), b))
    return params


def _ref_forward(obs, params, n_actions):
    """Plain-JAX reference using the same precision ladder as the kernel."""
    x = obs.reshape(obs.shape[0], -1).astype(jnp.float32)
    h = x.astype(jnp.bfloat16)
    for i, (w, b) in enumerate(params):
        h = jnp.dot(h.astype(jnp.bfloat16), w,
                    preferred_element_type=jnp.float32) + b
        if i < 4:
            h = jnp.maximum(h, 0.0)
    # Match the kernel's bf16 writeback + f32 upcast.
    return h.astype(jnp.bfloat16).astype(jnp.float32)[:, :n_actions]


if __name__ == "__main__":
    key = jax.random.PRNGKey(0)

    # state_shape = (4, 4) -> flat state dim 16 ; action_shape = (8,) -> 8 actions
    state_shape = (4, 4)
    n_actions = 8
    state_dim = int(math.prod(state_shape))

    key, k_params = jax.random.split(key)
    params = init_params(k_params, state_dim, n_actions)

    # Case 1: small batch (single full-extent tile).
    key, k_obs = jax.random.split(key)
    obs_small = jax.random.normal(k_obs, (8,) + state_shape, dtype=jnp.float32)
    logits_small, _ = net_forward(obs_small, params, n_actions, state=None)
    logits_small = jax.block_until_ready(logits_small)
    ref_small = _ref_forward(obs_small, params, n_actions)
    assert logits_small.shape == (8, n_actions)
    assert jnp.allclose(logits_small, ref_small, atol=2e-2, rtol=2e-2)

    # Case 2: larger batch exercising the batch grid axis + a partial last tile
    # (300 rows -> two 160-row tiles, second one partial; no padding copy).
    key, k_obs2 = jax.random.split(key)
    obs_big = jax.random.normal(k_obs2, (300,) + state_shape, dtype=jnp.float32)
    logits_big, _ = net_forward(obs_big, params, n_actions, state=None)
    logits_big = jax.block_until_ready(logits_big)
    ref_big = _ref_forward(obs_big, params, n_actions)
    assert logits_big.shape == (300, n_actions)
    assert jnp.allclose(logits_big, ref_big, atol=2e-2, rtol=2e-2)

    print("KERNEL_OK")
</pallas_src>

<mosaic_0001>
module attributes {stable_mosaic.version = 11 : i64} {
  func.func @_mlp_kernel(%arg0: i32, %arg1: memref<8x16xf32, #tpu.memory_space<vmem>>, %arg2: memref<16x128xbf16, #tpu.memory_space<vmem>>, %arg3: memref<1x128xf32, #tpu.memory_space<vmem>>, %arg4: memref<128x128xbf16, #tpu.memory_space<vmem>>, %arg5: memref<1x128xf32, #tpu.memory_space<vmem>>, %arg6: memref<128x128xbf16, #tpu.memory_space<vmem>>, %arg7: memref<1x128xf32, #tpu.memory_space<vmem>>, %arg8: memref<128x128xbf16, #tpu.memory_space<vmem>>, %arg9: memref<1x128xf32, #tpu.memory_space<vmem>>, %arg10: memref<128x128xbf16, #tpu.memory_space<vmem>>, %arg11: memref<1x128xf32, #tpu.memory_space<vmem>>, %arg12: memref<8x128xbf16, #tpu.memory_space<vmem>>) attributes {dimension_semantics = [#tpu.dimension_semantics<parallel>], iteration_bounds = array<i64: 1>, scalar_prefetch = 0 : i64, scratch_operands = 0 : i64, tpu.core_type = #tpu.core_type<tc>, window_params = [{transform_indices = @transform_0, window_bounds = array<i64: 8, 16>}, {pipeline_mode = #tpu.pipeline_mode<synchronous>, transform_indices = @transform_1, window_bounds = array<i64: 16, 128>}, {pipeline_mode = #tpu.pipeline_mode<synchronous>, transform_indices = @transform_2, window_bounds = array<i64: 1, 128>}, {pipeline_mode = #tpu.pipeline_mode<synchronous>, transform_indices = @transform_3, window_bounds = array<i64: 128, 128>}, {pipeline_mode = #tpu.pipeline_mode<synchronous>, transform_indices = @transform_4, window_bounds = array<i64: 1, 128>}, {pipeline_mode = #tpu.pipeline_mode<synchronous>, transform_indices = @transform_5, window_bounds = array<i64: 128, 128>}, {pipeline_mode = #tpu.pipeline_mode<synchronous>, transform_indices = @transform_6, window_bounds = array<i64: 1, 128>}, {pipeline_mode = #tpu.pipeline_mode<synchronous>, transform_indices = @transform_7, window_bounds = array<i64: 128, 128>}, {pipeline_mode = #tpu.pipeline_mode<synchronous>, transform_indices = @transform_8, window_bounds = array<i64: 1, 128>}, {pipeline_mode = #tpu.pipeline_mode<synchronous>, transform_indices = @transform_9, window_bounds = array<i64: 128, 128>}, {pipeline_mode = #tpu.pipeline_mode<synchronous>, transform_indices = @transform_10, window_bounds = array<i64: 1, 128>}, {transform_indices = @transform_11, window_bounds = array<i64: 8, 128>}]} {
    %c0 = arith.constant 0 : index
    %c0_0 = arith.constant 0 : index
    %0 = vector.load %arg1[%c0, %c0_0] : memref<8x16xf32, #tpu.memory_space<vmem>>, vector<8x16xf32>
    %1 = arith.truncf %0 : vector<8x16xf32> to vector<8x16xbf16>
    %c0_1 = arith.constant 0 : index
    %c0_2 = arith.constant 0 : index
    %2 = vector.load %arg2[%c0_1, %c0_2] : memref<16x128xbf16, #tpu.memory_space<vmem>>, vector<16x128xbf16>
    %cst = arith.constant dense<0.000000e+00> : vector<8x128xf32>
    %3 = tpu.matmul %1, %2, %cst {dimension_numbers = #tpu.dot_dimension_numbers<[1], [0], [0], [1], [0, 0, 1, 1], [], []>} : vector<8x16xbf16>, vector<16x128xbf16>, vector<8x128xf32> -> vector<8x128xf32>
    %c0_3 = arith.constant 0 : index
    %c0_4 = arith.constant 0 : index
    %4 = vector.load %arg3[%c0_3, %c0_4] : memref<1x128xf32, #tpu.memory_space<vmem>>, vector<1x128xf32>
    %5 = vector.broadcast %4 : vector<1x128xf32> to vector<8x128xf32>
    %6 = arith.addf %3, %5 : vector<8x128xf32>
    %cst_5 = arith.constant 0.000000e+00 : f32
    %7 = vector.broadcast %cst_5 : f32 to vector<8x128xf32>
    %8 = arith.maximumf %6, %7 : vector<8x128xf32>
    %9 = arith.truncf %8 : vector<8x128xf32> to vector<8x128xbf16>
    %c0_6 = arith.constant 0 : index
    %c0_7 = arith.constant 0 : index
    %10 = vector.load %arg4[%c0_6, %c0_7] : memref<128x128xbf16, #tpu.memory_space<vmem>>, vector<128x128xbf16>
    %cst_8 = arith.constant dense<0.000000e+00> : vector<8x128xf32>
    %11 = tpu.matmul %9, %10, %cst_8 {dimension_numbers = #tpu.dot_dimension_numbers<[1], [0], [0], [1], [0, 0, 1, 1], [], []>} : vector<8x128xbf16>, vector<128x128xbf16>, vector<8x128xf32> -> vector<8x128xf32>
    %c0_9 = arith.constant 0 : index
    %c0_10 = arith.constant 0 : index
    %12 = vector.load %arg5[%c0_9, %c0_10] : memref<1x128xf32, #tpu.memory_space<vmem>>, vector<1x128xf32>
    %13 = vector.broadcast %12 : vector<1x128xf32> to vector<8x128xf32>
    %14 = arith.addf %11, %13 : vector<8x128xf32>
    %cst_11 = arith.constant 0.000000e+00 : f32
    %15 = vector.broadcast %cst_11 : f32 to vector<8x128xf32>
    %16 = arith.maximumf %14, %15 : vector<8x128xf32>
    %17 = arith.truncf %16 : vector<8x128xf32> to vector<8x128xbf16>
    %c0_12 = arith.constant 0 : index
    %c0_13 = arith.constant 0 : index
    %18 = vector.load %arg6[%c0_12, %c0_13] : memref<128x128xbf16, #tpu.memory_space<vmem>>, vector<128x128xbf16>
    %cst_14 = arith.constant dense<0.000000e+00> : vector<8x128xf32>
    %19 = tpu.matmul %17, %18, %cst_14 {dimension_numbers = #tpu.dot_dimension_numbers<[1], [0], [0], [1], [0, 0, 1, 1], [], []>} : vector<8x128xbf16>, vector<128x128xbf16>, vector<8x128xf32> -> vector<8x128xf32>
    %c0_15 = arith.constant 0 : index
    %c0_16 = arith.constant 0 : index
    %20 = vector.load %arg7[%c0_15, %c0_16] : memref<1x128xf32, #tpu.memory_space<vmem>>, vector<1x128xf32>
    %21 = vector.broadcast %20 : vector<1x128xf32> to vector<8x128xf32>
    %22 = arith.addf %19, %21 : vector<8x128xf32>
    %cst_17 = arith.constant 0.000000e+00 : f32
    %23 = vector.broadcast %cst_17 : f32 to vector<8x128xf32>
    %24 = arith.maximumf %22, %23 : vector<8x128xf32>
    %25 = arith.truncf %24 : vector<8x128xf32> to vector<8x128xbf16>
    %c0_18 = arith.constant 0 : index
    %c0_19 = arith.constant 0 : index
    %26 = vector.load %arg8[%c0_18, %c0_19] : memref<128x128xbf16, #tpu.memory_space<vmem>>, vector<128x128xbf16>
    %cst_20 = arith.constant dense<0.000000e+00> : vector<8x128xf32>
    %27 = tpu.matmul %25, %26, %cst_20 {dimension_numbers = #tpu.dot_dimension_numbers<[1], [0], [0], [1], [0, 0, 1, 1], [], []>} : vector<8x128xbf16>, vector<128x128xbf16>, vector<8x128xf32> -> vector<8x128xf32>
    %c0_21 = arith.constant 0 : index
    %c0_22 = arith.constant 0 : index
    %28 = vector.load %arg9[%c0_21, %c0_22] : memref<1x128xf32, #tpu.memory_space<vmem>>, vector<1x128xf32>
    %29 = vector.broadcast %28 : vector<1x128xf32> to vector<8x128xf32>
    %30 = arith.addf %27, %29 : vector<8x128xf32>
    %cst_23 = arith.constant 0.000000e+00 : f32
    %31 = vector.broadcast %cst_23 : f32 to vector<8x128xf32>
    %32 = arith.maximumf %30, %31 : vector<8x128xf32>
    %33 = arith.truncf %32 : vector<8x128xf32> to vector<8x128xbf16>
    %c0_24 = arith.constant 0 : index
    %c0_25 = arith.constant 0 : index
    %34 = vector.load %arg10[%c0_24, %c0_25] : memref<128x128xbf16, #tpu.memory_space<vmem>>, vector<128x128xbf16>
    %cst_26 = arith.constant dense<0.000000e+00> : vector<8x128xf32>
    %35 = tpu.matmul %33, %34, %cst_26 {dimension_numbers = #tpu.dot_dimension_numbers<[1], [0], [0], [1], [0, 0, 1, 1], [], []>} : vector<8x128xbf16>, vector<128x128xbf16>, vector<8x128xf32> -> vector<8x128xf32>
    %c0_27 = arith.constant 0 : index
    %c0_28 = arith.constant 0 : index
    %36 = vector.load %arg11[%c0_27, %c0_28] : memref<1x128xf32, #tpu.memory_space<vmem>>, vector<1x128xf32>
    %37 = vector.broadcast %36 : vector<1x128xf32> to vector<8x128xf32>
    %38 = arith.addf %35, %37 : vector<8x128xf32>
    %39 = arith.truncf %38 : vector<8x128xf32> to vector<8x128xbf16>
    %c0_29 = arith.constant 0 : index
    %c0_30 = arith.constant 0 : index
    %40 = vector.load %arg12[%c0_29, %c0_30] : memref<8x128xbf16, #tpu.memory_space<vmem>>, vector<8x128xbf16>
    tpu.vector_store %arg12[%c0_29, %c0_30], %39 {strides = array<i32>} : memref<8x128xbf16, #tpu.memory_space<vmem>>, vector<8x128xbf16>,
    return
  }
  func.func @transform_0(%arg0: i32) -> (i32, i32) {
    %c0_i32 = arith.constant 0 : i32
    %c0_i32_0 = arith.constant 0 : i32
    return %arg0, %c0_i32 : i32, i32
  }
  func.func @transform_1(%arg0: i32) -> (i32, i32) {
    %c0_i32 = arith.constant 0 : i32
    %c0_i32_0 = arith.constant 0 : i32
    %c0_i32_1 = arith.constant 0 : i32
    return %c0_i32, %c0_i32_0 : i32, i32
  }
  func.func @transform_2(%arg0: i32) -> (i32, i32) {
    %c0_i32 = arith.constant 0 : i32
    %c0_i32_0 = arith.constant 0 : i32
    %c0_i32_1 = arith.constant 0 : i32
    return %c0_i32, %c0_i32_0 : i32, i32
  }
  func.func @transform_3(%arg0: i32) -> (i32, i32) {
    %c0_i32 = arith.constant 0 : i32
    %c0_i32_0 = arith.constant 0 : i32
    %c0_i32_1 = arith.constant 0 : i32
    return %c0_i32, %c0_i32_0 : i32, i32
  }
  func.func @transform_4(%arg0: i32) -> (i32, i32) {
    %c0_i32 = arith.constant 0 : i32
    %c0_i32_0 = arith.constant 0 : i32
    %c0_i32_1 = arith.constant 0 : i32
    return %c0_i32, %c0_i32_0 : i32, i32
  }
  func.func @transform_5(%arg0: i32) -> (i32, i32) {
    %c0_i32 = arith.constant 0 : i32
    %c0_i32_0 = arith.constant 0 : i32
    %c0_i32_1 = arith.constant 0 : i32
    return %c0_i32, %c0_i32_0 : i32, i32
  }
  func.func @transform_6(%arg0: i32) -> (i32, i32) {
    %c0_i32 = arith.constant 0 : i32
    %c0_i32_0 = arith.constant 0 : i32
    %c0_i32_1 = arith.constant 0 : i32
    return %c0_i32, %c0_i32_0 : i32, i32
  }
  func.func @transform_7(%arg0: i32) -> (i32, i32) {
    %c0_i32 = arith.constant 0 : i32
    %c0_i32_0 = arith.constant 0 : i32
    %c0_i32_1 = arith.constant 0 : i32
    return %c0_i32, %c0_i32_0 : i32, i32
  }
  func.func @transform_8(%arg0: i32) -> (i32, i32) {
    %c0_i32 = arith.constant 0 : i32
    %c0_i32_0 = arith.constant 0 : i32
    %c0_i32_1 = arith.constant 0 : i32
    return %c0_i32, %c0_i32_0 : i32, i32
  }
  func.func @transform_9(%arg0: i32) -> (i32, i32) {
    %c0_i32 = arith.constant 0 : i32
    %c0_i32_0 = arith.constant 0 : i32
    %c0_i32_1 = arith.constant 0 : i32
    return %c0_i32, %c0_i32_0 : i32, i32
  }
  func.func @transform_10(%arg0: i32) -> (i32, i32) {
    %c0_i32 = arith.constant 0 : i32
    %c0_i32_0 = arith.constant 0 : i32
    %c0_i32_1 = arith.constant 0 : i32
    return %c0_i32, %c0_i32_0 : i32, i32
  }
  func.func @transform_11(%arg0: i32) -> (i32, i32) {
    %c0_i32 = arith.constant 0 : i32
    %c0_i32_0 = arith.constant 0 : i32
    return %arg0, %c0_i32 : i32, i32
  }
}

</mosaic_0001>

<bundles_post_ra>
// kernel: tpu_custom_call.1
= control target key start
LH: loop header
LB: loop body
LE: loop exit
PB: predicated region body
PF: predicated region fallthrough
CT: control target
= control target key end

     0   :  { %16 = vsyncpa [#allocation3], 0  ;;  %s1252_s0 = inlined_call_operand.hbm [shape: f32[8,16], index: 0, kind: input, shape index: {}]   ;;  %s1253_s1 = inlined_call_operand.hbm [shape: bf16[16,128], index: 1, kind: input, shape index: {}]   ;;  %s1254_s2 = inlined_call_operand.vmem [shape: f32[1,128], index: 2, kind: input, shape index: {}]   ;;  %s1255_s3 = inlined_call_operand.hbm [shape: bf16[128,128], index: 3, kind: input, shape index: {}]   ;;  %s1256_s4 = inlined_call_operand.vmem [shape: f32[1,128], index: 4, kind: input, shape index: {}]   ;;  %s1257_s5 = inlined_call_operand.hbm [shape: bf16[128,128], index: 5, kind: input, shape index: {}]   ;;  %s1258_s6 = inlined_call_operand.vmem [shape: f32[1,128], index: 6, kind: input, shape index: {}]   ;;  %s1259_s7 = inlined_call_operand.hbm [shape: bf16[128,128], index: 7, kind: input, shape index: {}]   ;;  %s1260_s8 = inlined_call_operand.vmem [shape: f32[1,128], index: 8, kind: input, shape index: {}]   ;;  %s1261_s9 = inlined_call_operand.hbm [shape: bf16[128,128], index: 9, kind: input, shape index: {}]   ;;  %s1262_s10 = inlined_call_operand.vmem [shape: f32[1,128], index: 10, kind: input, shape index: {}]   ;;  %s1263_s11 = inlined_call_operand.hbm [shape: bf16[8,128], index: 11, kind: output, shape index: {}]  }
   0x1   :  { %17 = vsyncpa [#allocation6], 0 }
   0x2   :  { %18 = vsyncpa [#allocation9], 0 }
   0x3   :  { %19 = vsyncpa [#allocation12], 0 }
   0x4   :  { %20 = vsyncpa [#allocation4], 0  ;;  %s1024_s17 = smov [#allocation5]   ;;  %s860_s21 = scalar_lea.hbm %s1253_s1, 128 }
   0x5   :  { %s36_s18 = sshll.u32 %s1024_s17, 4  ;;  %p861_p0 = scmp.ne.s32.totalorder %s1253_s1, %s860_s21  ;;  %s37_s18 = int_to_ptr.vmem [resolvable:$true] %s36_s18 }
   0x6   :  { %p864_p1 = scmp.lt.u32.totalorder %s860_s21, %s1253_s1 }
   0x8   :  { %p866_p2 = pnand %p864_p1, %p861_p0 }
   0xa   :  { %869 = shalt.err (!%p866_p2)
}
   0xb   :  { %s870_s26 = scalar_lea.vmem %s37_s18, 128  ;;  %p875_p4 = scmp.lt.s32.totalorder %s37_s18, %s37_s18 }
   0xc   :  { %p871_p3 = scmp.ne.s32.totalorder %s37_s18, %s870_s26  ;;  %p876_p5 = scmp.lt.s32.totalorder %s870_s26, %s870_s26 }
   0xe   :  { %p877_p6 = por %p876_p5, %p875_p4 }
  0x10   :  { %p878_p7 = pnand %p877_p6, %p871_p3 }
  0x12   :  { %881 = shalt.err (!%p878_p7)
}
  0x13   :  { %s1025_s27 = smov 64   ;;  %s1026_s28 = smov 4  }
  0x14   :  { %42 = dma.hbm_to_vmem [thread:$0]  %s1253_s1, 128, %s37_s18, [#allocation6], %s1025_s27, %s1025_s27, %s1026_s28  }
  0x15   :  { %s1027_s12 = smov [#allocation8]   ;;  %s1028_s14 = smov [#allocation2]  }
  0x16   :  { %s64_s13 = sshll.u32 %s1027_s12, 4  ;;  %s27_s15 = sshll.u32 %s1028_s14, 4  ;;  %s65_s13 = int_to_ptr.vmem [resolvable:$true] %s64_s13  ;;  %s28_s15 = int_to_ptr.vmem [resolvable:$true] %s27_s15 }
  0x17   :  { %s882_s19 = scalar_lea.hbm %s1257_s5, 1024 }
  0x18   :  { %p883_p8 = scmp.ne.s32.totalorder %s1257_s5, %s882_s19  ;;  %p886_p9 = scmp.lt.u32.totalorder %s882_s19, %s1257_s5 }
  0x1a   :  { %p888_p10 = pnand %p886_p9, %p883_p8 }
  0x1c   :  { %891 = shalt.err (!%p888_p10)
}
  0x1d   :  { %s892_s1 = scalar_lea.vmem %s65_s13, 1024  ;;  %p897_p12 = scmp.lt.s32.totalorder %s65_s13, %s65_s13 }
  0x1e   :  { %p893_p11 = scmp.ne.s32.totalorder %s65_s13, %s892_s1  ;;  %p898_p13 = scmp.lt.s32.totalorder %s892_s1, %s892_s1 }
  0x20   :  { %p899_p0 = por %p898_p13, %p897_p12 }
  0x22   :  { %p900_p1 = pnand %p899_p0, %p893_p11 }
  0x24   :  { %903 = shalt.err (!%p900_p1)
}
  0x25   :  { %70 = dma.hbm_to_vmem [thread:$0]  %s1257_s5, 1024, %s65_s13, [#allocation9], %s1025_s27, %s1025_s27, %s1026_s28  }
  0x26   :  { %s904_s29 = scalar_lea.hbm %s1252_s0, 128 }
  0x27   :  { %p905_p2 = scmp.ne.s32.totalorder %s1252_s0, %s904_s29  ;;  %p908_p3 = scmp.lt.u32.totalorder %s904_s29, %s1252_s0 }
  0x29   :  { %p910_p4 = pnand %p908_p3, %p905_p2 }
  0x2b   :  { %913 = shalt.err (!%p910_p4)
}
  0x2c   :  { %s914_s17 = scalar_lea.vmem %s28_s15, 128  ;;  %p919_p6 = scmp.lt.s32.totalorder %s28_s15, %s28_s15 }
  0x2d   :  { %p915_p5 = scmp.ne.s32.totalorder %s28_s15, %s914_s17  ;;  %p920_p7 = scmp.lt.s32.totalorder %s914_s17, %s914_s17 }
  0x2f   :  { %p921_p8 = por %p920_p7, %p919_p6 }
  0x31   :  { %p922_p9 = pnand %p921_p8, %p915_p5 }
  0x33   :  { %925 = shalt.err (!%p922_p9)
}
  0x34   :  { %30 = dma.hbm_to_vmem [thread:$0]  %s1252_s0, 128, %s28_s15, [#allocation3]  }
  0x35   :  { %s1029_s19 = smov [#allocation7]   ;;  %s1030_s21 = smov [#allocation10]  }
  0x36   :  { %s50_s20 = sshll.u32 %s1029_s19, 4  ;;  %s78_s22 = sshll.u32 %s1030_s21, 4  ;;  %s51_s20 = int_to_ptr.vmem [resolvable:$true] %s50_s20  ;;  %s79_s22 = int_to_ptr.vmem [resolvable:$true] %s78_s22 }
  0x37   :  { %s926_s18 = scalar_lea.hbm %s1255_s3, 1024 }
  0x38   :  { %p927_p10 = scmp.ne.s32.totalorder %s1255_s3, %s926_s18  ;;  %p930_p11 = scmp.lt.u32.totalorder %s926_s18, %s1255_s3 }
  0x3a   :  { %p932_p12 = pnand %p930_p11, %p927_p10 }
  0x3c   :  { %935 = shalt.err (!%p932_p12)
}
  0x3d   :  { %s936_s0 = scalar_lea.vmem %s51_s20, 1024  ;;  %p941_p0 = scmp.lt.s32.totalorder %s51_s20, %s51_s20 }
  0x3e   :  { %p937_p13 = scmp.ne.s32.totalorder %s51_s20, %s936_s0  ;;  %p942_p1 = scmp.lt.s32.totalorder %s936_s0, %s936_s0 }
  0x40   :  { %p943_p2 = por %p942_p1, %p941_p0 }
  0x42   :  { %p944_p3 = pnand %p943_p2, %p937_p13 }
  0x44   :  { %947 = shalt.err (!%p944_p3)
}
  0x45   :  { %56 = dma.hbm_to_vmem [thread:$0]  %s1255_s3, 1024, %s51_s20, [#allocation6], %s1025_s27, %s1025_s27, %s1026_s28  }
  0x46   :  { %s948_s16 = scalar_lea.hbm %s1259_s7, 1024 }
  0x47   :  { %p949_p4 = scmp.ne.s32.totalorder %s1259_s7, %s948_s16  ;;  %p952_p5 = scmp.lt.u32.totalorder %s948_s16, %s1259_s7 }
  0x49   :  { %p954_p6 = pnand %p952_p5, %p949_p4 }
  0x4b   :  { %957 = shalt.err (!%p954_p6)
}
  0x4c   :  { %s958_s21 = scalar_lea.vmem %s79_s22, 1024  ;;  %p963_p8 = scmp.lt.s32.totalorder %s79_s22, %s79_s22 }
  0x4d   :  { %p959_p7 = scmp.ne.s32.totalorder %s79_s22, %s958_s21  ;;  %p964_p9 = scmp.lt.s32.totalorder %s958_s21, %s958_s21 }
  0x4f   :  { %p965_p10 = por %p964_p9, %p963_p8 }
  0x51   :  { %p966_p11 = pnand %p965_p10, %p959_p7 }
  0x53   :  { %969 = shalt.err (!%p966_p11)
}
  0x54   :  { %84 = dma.hbm_to_vmem [thread:$0]  %s1259_s7, 1024, %s79_s22, [#allocation9], %s1025_s27, %s1025_s27, %s1026_s28  }
  0x55   :  { %s1031_s23 = smov [#allocation11]   ;;  %s970_s25 = scalar_lea.hbm %s1261_s9, 1024 }
  0x56   :  { %s92_s1 = sshll.u32 %s1031_s23, 4  ;;  %p971_p12 = scmp.ne.s32.totalorder %s1261_s9, %s970_s25  ;;  %s93_s1 = int_to_ptr.vmem [resolvable:$true] %s92_s1 }
  0x57   :  { %p974_p13 = scmp.lt.u32.totalorder %s970_s25, %s1261_s9 }
  0x59   :  { %p976_p0 = pnand %p974_p13, %p971_p12 }
  0x5b   :  { %979 = shalt.err (!%p976_p0)
}
  0x5c   :  { %s980_s30 = scalar_lea.vmem %s93_s1, 1024  ;;  %p985_p2 = scmp.lt.s32.totalorder %s93_s1, %s93_s1 }
  0x5d   :  { %p981_p1 = scmp.ne.s32.totalorder %s93_s1, %s980_s30  ;;  %p986_p3 = scmp.lt.s32.totalorder %s980_s30, %s980_s30 }
  0x5f   :  { %p987_p4 = por %p986_p3, %p985_p2 }
  0x61   :  { %p988_p5 = pnand %p987_p4, %p981_p1 }
  0x63   :  { %991 = shalt.err (!%p988_p5)
}
  0x64   :  { %98 = dma.hbm_to_vmem [thread:$0]  %s1261_s9, 1024, %s93_s1, [#allocation12], %s1025_s27, %s1025_s27, %s1026_s28  }
  0x65   :  { %1014 = dma.done.wait [#allocation3], 128  }
  0x66   :  { %1015 = vsyncadd [#allocation3], 4294967168 }
  0x67   :  { %1016 = dma.done.wait [#allocation6], 1152  }
  0x68   :  { %1017 = vsyncadd [#allocation6], 4294966144 }
  0x69   :  { %1018 = dma.done.wait [#allocation9], 2048  }
  0x6a   :  { %1019 = vsyncadd [#allocation9], 4294965248 }
  0x6b   :  { %1020 = dma.done.wait [#allocation12], 1024  }
  0x6c   :  { %1021 = vsyncadd [#allocation12], 4294966272  ;;  %v1032_v0 = vmov 0.0   ;;  %vm1033_vm0 = vmmov 0   ;;  %v827_v1 = vld [vmem:[#allocation5] sm:$0xff]   ;;  %v120_v2 = vld [vmem:[#allocation2] sm:$0xff] }
  0x6d   :  { %730 = vmatprep.subr.bf16.mxu0 %v1032_v0  ;;  %732 = vmatprep.mubr.msk.bf16.mxu0 %vm1033_vm0, %v1032_v0  ;;  %v121_v3 = vpack.c.bf16 %v120_v2, %v120_v2  ;;  %vm137_vm1 = vcmask 130048   ;;  %v828_v4 = vld [vmem:[#allocation7] sm:$0xff]   ;;  %v829_v5 = vld [vmem:[#allocation7 + $0x8] sm:$0xff]   ;;  %v830_v6 = vld [vmem:[#allocation7 + $0x10] sm:$0xff]   ;;  %s1034_s5 = smov [#allocation13]  }
  0x6e   :  { %736 = vmatprep.subr.bf16.mxu1 %v1032_v0  ;;  %752 = vmatprep.mubr.msk.bf16.mxu1 %vm1033_vm0, %v1032_v0  ;;  %v831_v7 = vld [vmem:[#allocation7 + $0x18] sm:$0xff]   ;;  %v832_v8 = vld [vmem:[#allocation7 + $0x20] sm:$0xff]   ;;  %v833_v9 = vld [vmem:[#allocation7 + $0x28] sm:$0xff]   ;;  %s641_s13 = sshll.u32 %s1034_s5, 4  ;;  %s642_s13 = int_to_ptr.vmem [resolvable:$true] %s641_s13 }
  0x6f   :  { %731 = vmatpush3.bf16.msra.mxu0 %v827_v1  ;;  %737 = vmatpush3.bf16.msra.mxu1 %v828_v4  ;;  %v834_v10 = vld [vmem:[#allocation7 + $0x30] sm:$0xff]   ;;  %v835_v11 = vld [vmem:[#allocation7 + $0x38] sm:$0xff]   ;;  %v836_v12 = vld [vmem:[#allocation8] sm:$0xff]   ;;  %p997_p7 = scmp.lt.s32.totalorder %s642_s13, %s642_s13 }
  0x70   :  { %756 = vmatprep.subr.bf16.mxu0 %v1032_v0  ;;  %738 = vmatprep.subr.bf16.mxu1 %v1032_v0  ;;  %v837_v13 = vld [vmem:[#allocation8 + $0x8] sm:$0xff]   ;;  %v838_v14 = vld [vmem:[#allocation8 + $0x10] sm:$0xff]   ;;  %v839_v15 = vld [vmem:[#allocation8 + $0x18] sm:$0xff]  }
  0x71   :  { %v840_v16 = vld [vmem:[#allocation8 + $0x20] sm:$0xff]   ;;  %v841_v17 = vld [vmem:[#allocation8 + $0x28] sm:$0xff]   ;;  %v653_v18 = vld [vmem:[%s1254_s2] ss:$0 sm:$0xff] }
  0x72   :  { %733 = vmatmul.mubr.msk.bf16.vlgmr.msra.gmra.mrb[0].mxu0 %vm137_vm1, %v121_v3  ;;  %v842_v26 = vld [vmem:[#allocation8 + $0x30] sm:$0xff]   ;;  %v843_v27 = vld [vmem:[#allocation8 + $0x38] sm:$0xff]   ;;  %v844_v28 = vld [vmem:[#allocation10] sm:$0xff]  }
  0x73   :  { %772 = vmatprep.mubr.msk.bf16.mxu0 %vm1033_vm0, %v1032_v0  ;;  %739 = vmatpush3.bf16.msra.mxu1 %v829_v5  ;;  %v845_v29 = vld [vmem:[#allocation10 + $0x8] sm:$0xff]   ;;  %v846_v30 = vld [vmem:[#allocation10 + $0x10] sm:$0xff]   ;;  %v847_v31 = vld [vmem:[#allocation10 + $0x18] sm:$0xff]  }
  0x74   :  { %740 = vmatprep.subr.bf16.mxu1 %v1032_v0  ;;  %757 = vmatpush3.bf16.msra.mxu0 %v836_v12  ;;  %v848_v32 = vld [vmem:[#allocation10 + $0x20] sm:$0xff]   ;;  %v849_v33 = vld [vmem:[#allocation10 + $0x28] sm:$0xff]   ;;  %v656_v34 = vld [vmem:[%s1256_s4] ss:$0 sm:$0xff] }
  0x75   :  { %758 = vmatprep.subr.bf16.mxu0 %v1032_v0  ;;  %v850_v42 = vld [vmem:[#allocation10 + $0x30] sm:$0xff]   ;;  %v851_v43 = vld [vmem:[#allocation10 + $0x38] sm:$0xff]   ;;  %v852_v44 = vld [vmem:[#allocation11] sm:$0xff]  }
  0x76   :  { %v853_v45 = vld [vmem:[#allocation11 + $0x8] sm:$0xff]   ;;  %v854_v46 = vld [vmem:[#allocation11 + $0x10] sm:$0xff]   ;;  %v855_v47 = vld [vmem:[#allocation11 + $0x18] sm:$0xff]  }
  0x77   :  { %741 = vmatpush3.bf16.msra.mxu1 %v830_v6  ;;  %v856_v48 = vld [vmem:[#allocation11 + $0x20] sm:$0xff]   ;;  %v857_v49 = vld [vmem:[#allocation11 + $0x28] sm:$0xff]   ;;  %v665_v50 = vld [vmem:[%s1258_s6] ss:$0 sm:$0xff] }
  0x78   :  { %742 = vmatprep.subr.bf16.mxu1 %v1032_v0  ;;  %759 = vmatpush3.bf16.msra.mxu0 %v837_v13  ;;  %v858_v58 = vld [vmem:[#allocation11 + $0x30] sm:$0xff]   ;;  %v859_v59 = vld [vmem:[#allocation11 + $0x38] sm:$0xff]  }
  0x79   :  { %760 = vmatprep.subr.bf16.mxu0 %v1032_v0  ;;  %v674_v60 = vld [vmem:[%s1260_s8] ss:$0 sm:$0xff]  ;;  %s992_s8 = scalar_lea.vmem %s642_s13, 64 }
  0x7a   :  { %v683_v5 = vld [vmem:[%s1262_s10] ss:$0 sm:$0xff]  ;;  %p993_p6 = scmp.ne.s32.totalorder %s642_s13, %s992_s8  ;;  %p998_p8 = scmp.lt.s32.totalorder %s992_s8, %s992_s8 }
  0x7b   :  { %743 = vmatpush3.bf16.msra.mxu1 %v831_v7 }
  0x7c   :  { %744 = vmatprep.subr.bf16.mxu1 %v1032_v0  ;;  %761 = vmatpush3.bf16.msra.mxu0 %v838_v14  ;;  %p999_p9 = por %p998_p8, %p997_p7 }
  0x7d   :  { %762 = vmatprep.subr.bf16.mxu0 %v1032_v0 }
  0x7e   :  { %p1000_p10 = pnand %p999_p9, %p993_p6 }
  0x7f   :  { %745 = vmatpush3.bf16.msra.mxu1 %v832_v8 }
  0x80   :  { %746 = vmatprep.subr.bf16.mxu1 %v1032_v0  ;;  %763 = vmatpush3.bf16.msra.mxu0 %v839_v15 }
  0x81   :  { %764 = vmatprep.subr.bf16.mxu0 %v1032_v0 }
  0x83   :  { %747 = vmatpush3.bf16.msra.mxu1 %v833_v9 }
  0x84   :  { %748 = vmatprep.subr.bf16.mxu1 %v1032_v0  ;;  %765 = vmatpush3.bf16.msra.mxu0 %v840_v16 }
  0x85   :  { %766 = vmatprep.subr.bf16.mxu0 %v1032_v0 }
  0x87   :  { %749 = vmatpush3.bf16.msra.mxu1 %v834_v10 }
  0x88   :  { %750 = vmatprep.subr.bf16.mxu1 %v1032_v0  ;;  %767 = vmatpush3.bf16.msra.mxu0 %v841_v17 }
  0x89   :  { %768 = vmatprep.subr.bf16.mxu0 %v1032_v0 }
  0x8b   :  { %751 = vmatpush3.bf16.msra.mxu1 %v835_v11 }
  0x8c   :  { %776 = vmatprep.subr.bf16.mxu1 %v1032_v0  ;;  %769 = vmatpush3.bf16.msra.mxu0 %v842_v26 }
  0x8d   :  { %770 = vmatprep.subr.bf16.mxu0 %v1032_v0 }
  0x90   :  { %771 = vmatpush3.bf16.msra.mxu0 %v843_v27 }
  0x91   :  { %796 = vmatprep.subr.bf16.mxu0 %v1032_v0 }
 0x145   :  { %v175_v19 = vpop.f32.mrb[0].mxu0 }
 0x146   :  { %v176_v20 = vadd.f32 %v653_v18, %v175_v19  ;;  %v734_v21 = vpop.f32.mrb[1].mxu0 }
 0x147   :  { %v178_v22 = vpop.f32.mrb[2].mxu0 }
 0x148   :  { %v181_v23 = vmax.f32 %v176_v20, 0.0  ;;  %v735_v24 = vpop.f32.mrb[3].mxu0 }
 0x14a   :  { %v182_v25 = vpack.c.bf16 %v181_v23, %v181_v23 }
 0x14c   :  { %753 = vmatmul.mubr.bf16.vlgmr.msra.gmra.mrb[0].mxu1 %v182_v25 }
 0x14d   :  { %792 = vmatprep.mubr.msk.bf16.mxu1 %vm1033_vm0, %v1032_v0  ;;  %777 = vmatpush3.bf16.msra.mxu1 %v844_v28 }
 0x14e   :  { %778 = vmatprep.subr.bf16.mxu1 %v1032_v0 }
 0x151   :  { %779 = vmatpush3.bf16.msra.mxu1 %v845_v29 }
 0x152   :  { %780 = vmatprep.subr.bf16.mxu1 %v1032_v0 }
 0x155   :  { %781 = vmatpush3.bf16.msra.mxu1 %v846_v30 }
 0x156   :  { %782 = vmatprep.subr.bf16.mxu1 %v1032_v0 }
 0x159   :  { %783 = vmatpush3.bf16.msra.mxu1 %v847_v31 }
 0x15a   :  { %784 = vmatprep.subr.bf16.mxu1 %v1032_v0 }
 0x15d   :  { %785 = vmatpush3.bf16.msra.mxu1 %v848_v32 }
 0x15e   :  { %786 = vmatprep.subr.bf16.mxu1 %v1032_v0 }
 0x161   :  { %787 = vmatpush3.bf16.msra.mxu1 %v849_v33 }
 0x162   :  { %788 = vmatprep.subr.bf16.mxu1 %v1032_v0 }
 0x165   :  { %789 = vmatpush3.bf16.msra.mxu1 %v850_v42 }
 0x166   :  { %790 = vmatprep.subr.bf16.mxu1 %v1032_v0 }
 0x169   :  { %791 = vmatpush3.bf16.msra.mxu1 %v851_v43 }
 0x21f   :  { %v288_v35 = vpop.f32.mrb[0].mxu1 }
 0x220   :  { %v289_v36 = vadd.f32 %v656_v34, %v288_v35  ;;  %v754_v37 = vpop.f32.mrb[1].mxu1 }
 0x221   :  { %v291_v38 = vpop.f32.mrb[2].mxu1 }
 0x222   :  { %v294_v39 = vmax.f32 %v289_v36, 0.0  ;;  %v755_v40 = vpop.f32.mrb[3].mxu1 }
 0x224   :  { %v295_v41 = vpack.c.bf16 %v294_v39, %v294_v39 }
 0x226   :  { %773 = vmatmul.mubr.bf16.vlgmr.msra.gmra.mrb[4].mxu0 %v295_v41 }
 0x227   :  { %812 = vmatprep.mubr.msk.bf16.mxu0 %vm1033_vm0, %v1032_v0  ;;  %797 = vmatpush3.bf16.msra.mxu0 %v852_v44 }
 0x228   :  { %798 = vmatprep.subr.bf16.mxu0 %v1032_v0 }
 0x22b   :  { %799 = vmatpush3.bf16.msra.mxu0 %v853_v45 }
 0x22c   :  { %800 = vmatprep.subr.bf16.mxu0 %v1032_v0 }
 0x22f   :  { %801 = vmatpush3.bf16.msra.mxu0 %v854_v46 }
 0x230   :  { %802 = vmatprep.subr.bf16.mxu0 %v1032_v0 }
 0x233   :  { %803 = vmatpush3.bf16.msra.mxu0 %v855_v47 }
 0x234   :  { %804 = vmatprep.subr.bf16.mxu0 %v1032_v0 }
 0x237   :  { %805 = vmatpush3.bf16.msra.mxu0 %v856_v48 }
 0x238   :  { %806 = vmatprep.subr.bf16.mxu0 %v1032_v0 }
 0x23b   :  { %807 = vmatpush3.bf16.msra.mxu0 %v857_v49 }
 0x23c   :  { %808 = vmatprep.subr.bf16.mxu0 %v1032_v0 }
 0x23f   :  { %809 = vmatpush3.bf16.msra.mxu0 %v858_v58 }
 0x240   :  { %810 = vmatprep.subr.bf16.mxu0 %v1032_v0 }
 0x243   :  { %811 = vmatpush3.bf16.msra.mxu0 %v859_v59 }
 0x2f9   :  { %v401_v51 = vpop.f32.mrb[4].mxu0 }
 0x2fa   :  { %v402_v52 = vadd.f32 %v665_v50, %v401_v51  ;;  %v774_v53 = vpop.f32.mrb[5].mxu0 }
 0x2fb   :  { %v404_v54 = vpop.f32.mrb[6].mxu0 }
 0x2fc   :  { %v407_v55 = vmax.f32 %v402_v52, 0.0  ;;  %v775_v56 = vpop.f32.mrb[7].mxu0 }
 0x2fe   :  { %v408_v57 = vpack.c.bf16 %v407_v55, %v407_v55 }
 0x300   :  { %793 = vmatmul.mubr.bf16.vlgmr.msra.gmra.mrb[4].mxu1 %v408_v57 }
 0x3d3   :  { %v514_v61 = vpop.f32.mrb[4].mxu1 }
 0x3d4   :  { %v515_v62 = vadd.f32 %v674_v60, %v514_v61  ;;  %v794_v63 = vpop.f32.mrb[5].mxu1 }
 0x3d5   :  { %v517_v1 = vpop.f32.mrb[6].mxu1 }
 0x3d6   :  { %v520_v2 = vmax.f32 %v515_v62, 0.0  ;;  %v795_v3 = vpop.f32.mrb[7].mxu1 }
 0x3d8   :  { %v521_v4 = vpack.c.bf16 %v520_v2, %v520_v2 }
 0x3da   :  { %813 = vmatmul.mubr.bf16.vlgmr.msra.gmra.mrb[8].mxu0 %v521_v4 }
 0x4ad   :  { %v627_v6 = vpop.f32.mrb[8].mxu0 }
 0x4ae   :  { %v628_v0 = vadd.f32 %v683_v5, %v627_v6  ;;  %v814_v7 = vpop.f32.mrb[9].mxu0 }
 0x4af   :  { %v630_v8 = vpop.f32.mrb[10].mxu0 }
 0x4b0   :  { %v633_v9 = vpack.c.bf16 %v628_v0, %v628_v0  ;;  %v815_v10 = vpop.f32.mrb[11].mxu0 }
 0x4b2   :  { %634 = vst [vmem:[#allocation13] sm:$0xf] %v633_v9 }
 0x4b3   :  { %1003 = shalt.err (!%p1000_p10)
}
 0x4b4   :  { %s1004_s10 = scalar_lea.hbm %s1263_s11, 64 }
 0x4b5   :  { %p1005_p11 = scmp.ne.s32.totalorder %s1263_s11, %s1004_s10  ;;  %p1008_p12 = scmp.lt.u32.totalorder %s1004_s10, %s1263_s11 }
 0x4b7   :  { %p1010_p13 = pnand %p1008_p12, %p1005_p11 }
 0x4b9   :  { %1013 = shalt.err (!%p1010_p13)
}
 0x4ba   :  { %644 = dma.vmem_to_hbm [thread:$0]  %s642_s13, 64, %s1263_s11, [#allocation4]  }
 0x4bb   :  { %1022 = dma.done.wait [#allocation4], 64  }
 0x4bc   :  { %1023 = vsyncadd [#allocation4], 4294967232 }
 0x4bd   :  { %648 = vsyncpa [#allocation3], 1 }
 0x4be   :  { %649 = vsyncpa [#allocation6], 1 }
 0x4bf   :  { %650 = vsyncpa [#allocation9], 1 }
 0x4c0   :  { %651 = vsyncpa [#allocation12], 1 }
 0x4c1   :  { %652 = vsyncpa [#allocation4], 1 }

</bundles_post_ra>
